<compile_context>
chip_gen: v7x
topology: tpu7x:2x2x1
jax: 0.10.0
libtpu: 0.0.40
codegen_flags: <defaults>
</compile_context>

<pallas_src>
import functools

import jax
import jax.numpy as jnp
from jax.experimental import pallas as pl
from jax.experimental.pallas import tpu as pltpu


def _round_up(x: int, m: int) -> int:
    return ((x + m - 1) // m) * m


def _pick_tile_rows(H: int, W: int, cout: int, bytes_budget: int = 1 << 20) -> int:
    """Largest row-tile TH dividing H whose f32 output tile fits the byte budget and
    whose flattened pixel count is lane-legal (multiple of 128, or the full image)."""
    for th in range(H, 0, -1):
        if H % th:
            continue
        tile = th * W
        lane_ok = (th == H) or (tile % 128 == 0)
        if lane_ok and cout * tile * 4 <= bytes_budget:
            return th
    return H


def _aspp_conv_kernel(x_ref, w_ref, mask_ref, scale_ref, shift_ref, o_ref, *,
                      width, dilation, tile):
    # x_ref      : (Cin, win_pad)  bf16  flattened input window (tile + halo) for this
    #                                    (batch, row-tile) grid point
    # w_ref      : (9, Cout, Cin)  bf16  3x3 tap weights
    # mask_ref   : (3, tile)       bf16  column validity mask per horizontal tap
    # scale/shift: (Cout, 1)       f32   folded eval-mode BatchNorm
    # o_ref      : (Cout, tile)    f32   lane-dense output tile
    cout = o_ref.shape[0]
    acc = jnp.zeros((cout, tile), jnp.float32)
    for ki in range(3):
        for kj in range(3):
            off = (ki * width + kj) * dilation          # static per-tap offset
            x_tap = x_ref[:, off:off + tile]            # (Cin, tile), static slice
            if kj != 1:                                 # zero horizontally-OOB columns
                x_tap = x_tap * mask_ref[kj:kj + 1, :]
            acc = acc + jnp.dot(w_ref[3 * ki + kj], x_tap,
                                preferred_element_type=jnp.float32)
    y = acc * scale_ref[...] + shift_ref[...]           # folded BatchNorm (f32)
    o_ref[...] = jnp.maximum(y, 0.0).astype(o_ref.dtype)


@functools.partial(jax.jit, static_argnames=("dilation", "eps"))
def aspp_conv_forward(x, weight, gamma, beta, running_mean, running_var,
                      *, dilation, eps=1e-5):
    """x: (N, Cin, H, W); weight: (Cout, Cin, 3, 3); BN params: (Cout,).
    Returns (N, Cout, H, W) = ReLU(BatchNorm(dilated 3x3 conv(x)))."""
    N, Cin, H, W = x.shape
    Cout = weight.shape[0]
    d = int(dilation)

    TH = _pick_tile_rows(H, W, Cout)
    tile = TH * W
    n_tiles = H // TH
    halo = (2 * W + 2) * d                              # largest static tap offset
    win_pad = _round_up(tile + halo, 128)

    # Channel-major, flattened pixels with a zero halo: d zero rows above/below,
    # d zero elements in front, and a zero tail so every window slice is in range.
    body = jnp.pad(x, ((0, 0), (0, 0), (d, d), (0, 0))).reshape(
        N, Cin, (H + 2 * d) * W)
    flat_len = (n_tiles - 1) * tile + win_pad
    tail = max(flat_len - d - body.shape[-1], 0)
    x_flat = jnp.pad(body, ((0, 0), (0, 0), (d, tail))).astype(jnp.bfloat16)

    # Per-row-tile windows (tile + halo) so the kernel only uses static slices and the
    # pipeline DMAs exactly one window per grid step (duplication is just the halo).
    x_win = jnp.stack(
        [jax.lax.slice_in_dim(x_flat, r * tile, r * tile + win_pad, axis=2)
         for r in range(n_tiles)], axis=1)              # (N, n_tiles, Cin, win_pad)

    w_taps = jnp.transpose(weight, (2, 3, 0, 1)).reshape(
        9, Cout, Cin).astype(jnp.bfloat16)

    col = jnp.arange(tile, dtype=jnp.int32) % W
    mask = jnp.stack([(col >= d).astype(jnp.bfloat16),
                      jnp.ones((tile,), jnp.bfloat16),
                      (col < W - d).astype(jnp.bfloat16)], axis=0)   # (3, tile)

    # TODO(synk): BatchNorm is folded using eval-mode running statistics; training-mode
    # batch statistics would need an extra cross-batch reduction pass over the conv output.
    scale = (gamma / jnp.sqrt(running_var + eps)).astype(jnp.float32)
    shift = (beta - running_mean * scale).astype(jnp.float32)
    scale = scale.reshape(Cout, 1)
    shift = shift.reshape(Cout, 1)

    kernel = functools.partial(_aspp_conv_kernel, width=W, dilation=d, tile=tile)
    out_flat = pl.pallas_call(
        kernel,
        out_shape=jax.ShapeDtypeStruct((N, Cout, H * W), jnp.float32),
        grid_spec=pltpu.PrefetchScalarGridSpec(
            num_scalar_prefetch=0,
            grid=(N, n_tiles),
            in_specs=[
                pl.BlockSpec((None, None, Cin, win_pad), lambda n, r: (n, r, 0, 0)),
                pl.BlockSpec((9, Cout, Cin), lambda n, r: (0, 0, 0)),
                pl.BlockSpec((3, tile), lambda n, r: (0, 0)),
                pl.BlockSpec((Cout, 1), lambda n, r: (0, 0)),
                pl.BlockSpec((Cout, 1), lambda n, r: (0, 0)),
            ],
            out_specs=pl.BlockSpec((None, Cout, tile), lambda n, r: (n, 0, r)),
        ),
        compiler_params=pltpu.CompilerParams(
            dimension_semantics=("parallel", "parallel"),
            vmem_limit_bytes=32 * 1024 * 1024,
        ),
    )(x_win, w_taps, mask, scale, shift)

    return out_flat.reshape(N, Cout, H, W)


if __name__ == "__main__":
    key = jax.random.PRNGKey(0)
    k_x, k_w, k_g, k_b, k_m, k_v = jax.random.split(key, 6)

    # Small shapes consistent with ASPPConv: N=2, Cin=4, H=W=16, Cout=8, dilation=2.
    N, Cin, H, W = 2, 4, 16, 16
    Cout, dilation = 8, 2
    eps = 1e-5

    x = jax.random.normal(k_x, (N, Cin, H, W), dtype=jnp.float32)

    fan_in = Cin * 3 * 3
    bound = 1.0 / (fan_in ** 0.5)
    weight = jax.random.uniform(k_w, (Cout, Cin, 3, 3), jnp.float32, -bound, bound)

    gamma = jax.random.uniform(k_g, (Cout,), jnp.float32, 0.8, 1.2)
    beta = jax.random.uniform(k_b, (Cout,), jnp.float32, -0.1, 0.1)
    running_mean = 0.1 * jax.random.normal(k_m, (Cout,), dtype=jnp.float32)
    running_var = jax.random.uniform(k_v, (Cout,), jnp.float32, 0.5, 1.5)

    out = aspp_conv_forward(x, weight, gamma, beta, running_mean, running_var,
                            dilation=dilation, eps=eps)
    out = jax.block_until_ready(out)
    assert out.shape == (N, Cout, H, W)

    # Pure-JAX f32 reference: dilated 3x3 conv -> eval-mode BN -> ReLU.
    conv = jax.lax.conv_general_dilated(
        x, weight, window_strides=(1, 1),
        padding=((dilation, dilation), (dilation, dilation)),
        rhs_dilation=(dilation, dilation),
        dimension_numbers=("NCHW", "OIHW", "NCHW"))
    scale_ref = gamma / jnp.sqrt(running_var + eps)
    ref = conv * scale_ref[None, :, None, None] + \
        (beta - running_mean * scale_ref)[None, :, None, None]
    ref = jnp.maximum(ref, 0.0)

    # Kernel uses bf16 MXU operands with f32 accumulation -> bf16-level tolerance.
    err = float(jnp.max(jnp.abs(out - ref)))
    assert jnp.allclose(out, ref, atol=3e-2, rtol=3e-2), err

    print("KERNEL_OK")
</pallas_src>

<mosaic_0001>
module attributes {stable_mosaic.version = 11 : i64} {
  func.func @_aspp_conv_kernel(%arg0: i32, %arg1: i32, %arg2: memref<1x1x4x384xbf16, #tpu.memory_space<vmem>>, %arg3: memref<9x8x4xbf16, #tpu.memory_space<vmem>>, %arg4: memref<3x256xbf16, #tpu.memory_space<vmem>>, %arg5: memref<8x1xf32, #tpu.memory_space<vmem>>, %arg6: memref<8x1xf32, #tpu.memory_space<vmem>>, %arg7: memref<1x8x256xf32, #tpu.memory_space<vmem>>) attributes {dimension_semantics = [#tpu.dimension_semantics<parallel>, #tpu.dimension_semantics<parallel>], iteration_bounds = array<i64: 2, 1>, scalar_prefetch = 0 : i64, scratch_operands = 0 : i64, tpu.core_type = #tpu.core_type<tc>, window_params = [{transform_indices = @transform_0, window_bounds = array<i64: 1, 1, 4, 384>}, {pipeline_mode = #tpu.pipeline_mode<synchronous>, transform_indices = @transform_1, window_bounds = array<i64: 9, 8, 4>}, {pipeline_mode = #tpu.pipeline_mode<synchronous>, transform_indices = @transform_2, window_bounds = array<i64: 3, 256>}, {pipeline_mode = #tpu.pipeline_mode<synchronous>, transform_indices = @transform_3, window_bounds = array<i64: 8, 1>}, {pipeline_mode = #tpu.pipeline_mode<synchronous>, transform_indices = @transform_4, window_bounds = array<i64: 8, 1>}, {transform_indices = @transform_5, window_bounds = array<i64: 1, 8, 256>}]} {
    %cst = arith.constant 0.000000e+00 : f32
    %0 = vector.broadcast %cst : f32 to vector<8x256xf32>
    %c0 = arith.constant 0 : index
    %c0_0 = arith.constant 0 : index
    %c0_1 = arith.constant 0 : index
    %c0_2 = arith.constant 0 : index
    %1 = vector.load %arg2[%c0, %c0_0, %c0_1, %c0_2] : memref<1x1x4x384xbf16, #tpu.memory_space<vmem>>, vector<1x1x4x256xbf16>
    %2 = vector.shape_cast %1 : vector<1x1x4x256xbf16> to vector<4x256xbf16>
    %c0_3 = arith.constant 0 : index
    %c0_4 = arith.constant 0 : index
    %3 = vector.load %arg4[%c0_3, %c0_4] : memref<3x256xbf16, #tpu.memory_space<vmem>>, vector<1x256xbf16>
    %4 = vector.broadcast %3 : vector<1x256xbf16> to vector<4x256xbf16>
    %5 = arith.mulf %2, %4 : vector<4x256xbf16>
    %c0_5 = arith.constant 0 : index
    %c0_6 = arith.constant 0 : index
    %c0_7 = arith.constant 0 : index
    %6 = vector.load %arg3[%c0_5, %c0_6, %c0_7] : memref<9x8x4xbf16, #tpu.memory_space<vmem>>, vector<1x8x4xbf16>
    %7 = vector.shape_cast %6 : vector<1x8x4xbf16> to vector<8x4xbf16>
    %cst_8 = arith.constant dense<0.000000e+00> : vector<8x256xf32>
    %8 = tpu.matmul %7, %5, %cst_8 {dimension_numbers = #tpu.dot_dimension_numbers<[1], [0], [0], [1], [0, 0, 1, 1], [], []>} : vector<8x4xbf16>, vector<4x256xbf16>, vector<8x256xf32> -> vector<8x256xf32>
    %9 = arith.addf %0, %8 : vector<8x256xf32>
    %c0_9 = arith.constant 0 : index
    %c0_10 = arith.constant 0 : index
    %c0_11 = arith.constant 0 : index
    %c2 = arith.constant 2 : index
    %10 = vector.load %arg2[%c0_9, %c0_10, %c0_11, %c2] : memref<1x1x4x384xbf16, #tpu.memory_space<vmem>>, vector<1x1x4x256xbf16>
    %11 = vector.shape_cast %10 : vector<1x1x4x256xbf16> to vector<4x256xbf16>
    %c1 = arith.constant 1 : index
    %c0_12 = arith.constant 0 : index
    %c0_13 = arith.constant 0 : index
    %12 = vector.load %arg3[%c1, %c0_12, %c0_13] : memref<9x8x4xbf16, #tpu.memory_space<vmem>>, vector<1x8x4xbf16>
    %13 = vector.shape_cast %12 : vector<1x8x4xbf16> to vector<8x4xbf16>
    %cst_14 = arith.constant dense<0.000000e+00> : vector<8x256xf32>
    %14 = tpu.matmul %13, %11, %cst_14 {dimension_numbers = #tpu.dot_dimension_numbers<[1], [0], [0], [1], [0, 0, 1, 1], [], []>} : vector<8x4xbf16>, vector<4x256xbf16>, vector<8x256xf32> -> vector<8x256xf32>
    %15 = arith.addf %9, %14 : vector<8x256xf32>
    %c0_15 = arith.constant 0 : index
    %c0_16 = arith.constant 0 : index
    %c0_17 = arith.constant 0 : index
    %c4 = arith.constant 4 : index
    %16 = vector.load %arg2[%c0_15, %c0_16, %c0_17, %c4] : memref<1x1x4x384xbf16, #tpu.memory_space<vmem>>, vector<1x1x4x256xbf16>
    %17 = vector.shape_cast %16 : vector<1x1x4x256xbf16> to vector<4x256xbf16>
    %c2_18 = arith.constant 2 : index
    %c0_19 = arith.constant 0 : index
    %18 = vector.load %arg4[%c2_18, %c0_19] : memref<3x256xbf16, #tpu.memory_space<vmem>>, vector<1x256xbf16>
    %19 = vector.broadcast %18 : vector<1x256xbf16> to vector<4x256xbf16>
    %20 = arith.mulf %17, %19 : vector<4x256xbf16>
    %c2_20 = arith.constant 2 : index
    %c0_21 = arith.constant 0 : index
    %c0_22 = arith.constant 0 : index
    %21 = vector.load %arg3[%c2_20, %c0_21, %c0_22] : memref<9x8x4xbf16, #tpu.memory_space<vmem>>, vector<1x8x4xbf16>
    %22 = vector.shape_cast %21 : vector<1x8x4xbf16> to vector<8x4xbf16>
    %cst_23 = arith.constant dense<0.000000e+00> : vector<8x256xf32>
    %23 = tpu.matmul %22, %20, %cst_23 {dimension_numbers = #tpu.dot_dimension_numbers<[1], [0], [0], [1], [0, 0, 1, 1], [], []>} : vector<8x4xbf16>, vector<4x256xbf16>, vector<8x256xf32> -> vector<8x256xf32>
    %24 = arith.addf %15, %23 : vector<8x256xf32>
    %c0_24 = arith.constant 0 : index
    %c0_25 = arith.constant 0 : index
    %c0_26 = arith.constant 0 : index
    %c32 = arith.constant 32 : index
    %25 = vector.load %arg2[%c0_24, %c0_25, %c0_26, %c32] : memref<1x1x4x384xbf16, #tpu.memory_space<vmem>>, vector<1x1x4x256xbf16>
    %26 = vector.shape_cast %25 : vector<1x1x4x256xbf16> to vector<4x256xbf16>
    %c0_27 = arith.constant 0 : index
    %c0_28 = arith.constant 0 : index
    %27 = vector.load %arg4[%c0_27, %c0_28] : memref<3x256xbf16, #tpu.memory_space<vmem>>, vector<1x256xbf16>
    %28 = vector.broadcast %27 : vector<1x256xbf16> to vector<4x256xbf16>
    %29 = arith.mulf %26, %28 : vector<4x256xbf16>
    %c3 = arith.constant 3 : index
    %c0_29 = arith.constant 0 : index
    %c0_30 = arith.constant 0 : index
    %30 = vector.load %arg3[%c3, %c0_29, %c0_30] : memref<9x8x4xbf16, #tpu.memory_space<vmem>>, vector<1x8x4xbf16>
    %31 = vector.shape_cast %30 : vector<1x8x4xbf16> to vector<8x4xbf16>
    %cst_31 = arith.constant dense<0.000000e+00> : vector<8x256xf32>
    %32 = tpu.matmul %31, %29, %cst_31 {dimension_numbers = #tpu.dot_dimension_numbers<[1], [0], [0], [1], [0, 0, 1, 1], [], []>} : vector<8x4xbf16>, vector<4x256xbf16>, vector<8x256xf32> -> vector<8x256xf32>
    %33 = arith.addf %24, %32 : vector<8x256xf32>
    %c0_32 = arith.constant 0 : index
    %c0_33 = arith.constant 0 : index
    %c0_34 = arith.constant 0 : index
    %c34 = arith.constant 34 : index
    %34 = vector.load %arg2[%c0_32, %c0_33, %c0_34, %c34] : memref<1x1x4x384xbf16, #tpu.memory_space<vmem>>, vector<1x1x4x256xbf16>
    %35 = vector.shape_cast %34 : vector<1x1x4x256xbf16> to vector<4x256xbf16>
    %c4_35 = arith.constant 4 : index
    %c0_36 = arith.constant 0 : index
    %c0_37 = arith.constant 0 : index
    %36 = vector.load %arg3[%c4_35, %c0_36, %c0_37] : memref<9x8x4xbf16, #tpu.memory_space<vmem>>, vector<1x8x4xbf16>
    %37 = vector.shape_cast %36 : vector<1x8x4xbf16> to vector<8x4xbf16>
    %cst_38 = arith.constant dense<0.000000e+00> : vector<8x256xf32>
    %38 = tpu.matmul %37, %35, %cst_38 {dimension_numbers = #tpu.dot_dimension_numbers<[1], [0], [0], [1], [0, 0, 1, 1], [], []>} : vector<8x4xbf16>, vector<4x256xbf16>, vector<8x256xf32> -> vector<8x256xf32>
    %39 = arith.addf %33, %38 : vector<8x256xf32>
    %c0_39 = arith.constant 0 : index
    %c0_40 = arith.constant 0 : index
    %c0_41 = arith.constant 0 : index
    %c36 = arith.constant 36 : index
    %40 = vector.load %arg2[%c0_39, %c0_40, %c0_41, %c36] : memref<1x1x4x384xbf16, #tpu.memory_space<vmem>>, vector<1x1x4x256xbf16>
    %41 = vector.shape_cast %40 : vector<1x1x4x256xbf16> to vector<4x256xbf16>
    %c2_42 = arith.constant 2 : index
    %c0_43 = arith.constant 0 : index
    %42 = vector.load %arg4[%c2_42, %c0_43] : memref<3x256xbf16, #tpu.memory_space<vmem>>, vector<1x256xbf16>
    %43 = vector.broadcast %42 : vector<1x256xbf16> to vector<4x256xbf16>
    %44 = arith.mulf %41, %43 : vector<4x256xbf16>
    %c5 = arith.constant 5 : index
    %c0_44 = arith.constant 0 : index
    %c0_45 = arith.constant 0 : index
    %45 = vector.load %arg3[%c5, %c0_44, %c0_45] : memref<9x8x4xbf16, #tpu.memory_space<vmem>>, vector<1x8x4xbf16>
    %46 = vector.shape_cast %45 : vector<1x8x4xbf16> to vector<8x4xbf16>
    %cst_46 = arith.constant dense<0.000000e+00> : vector<8x256xf32>
    %47 = tpu.matmul %46, %44, %cst_46 {dimension_numbers = #tpu.dot_dimension_numbers<[1], [0], [0], [1], [0, 0, 1, 1], [], []>} : vector<8x4xbf16>, vector<4x256xbf16>, vector<8x256xf32> -> vector<8x256xf32>
    %48 = arith.addf %39, %47 : vector<8x256xf32>
    %c0_47 = arith.constant 0 : index
    %c0_48 = arith.constant 0 : index
    %c0_49 = arith.constant 0 : index
    %c64 = arith.constant 64 : index
    %49 = vector.load %arg2[%c0_47, %c0_48, %c0_49, %c64] : memref<1x1x4x384xbf16, #tpu.memory_space<vmem>>, vector<1x1x4x256xbf16>
    %50 = vector.shape_cast %49 : vector<1x1x4x256xbf16> to vector<4x256xbf16>
    %c0_50 = arith.constant 0 : index
    %c0_51 = arith.constant 0 : index
    %51 = vector.load %arg4[%c0_50, %c0_51] : memref<3x256xbf16, #tpu.memory_space<vmem>>, vector<1x256xbf16>
    %52 = vector.broadcast %51 : vector<1x256xbf16> to vector<4x256xbf16>
    %53 = arith.mulf %50, %52 : vector<4x256xbf16>
    %c6 = arith.constant 6 : index
    %c0_52 = arith.constant 0 : index
    %c0_53 = arith.constant 0 : index
    %54 = vector.load %arg3[%c6, %c0_52, %c0_53] : memref<9x8x4xbf16, #tpu.memory_space<vmem>>, vector<1x8x4xbf16>
    %55 = vector.shape_cast %54 : vector<1x8x4xbf16> to vector<8x4xbf16>
    %cst_54 = arith.constant dense<0.000000e+00> : vector<8x256xf32>
    %56 = tpu.matmul %55, %53, %cst_54 {dimension_numbers = #tpu.dot_dimension_numbers<[1], [0], [0], [1], [0, 0, 1, 1], [], []>} : vector<8x4xbf16>, vector<4x256xbf16>, vector<8x256xf32> -> vector<8x256xf32>
    %57 = arith.addf %48, %56 : vector<8x256xf32>
    %c0_55 = arith.constant 0 : index
    %c0_56 = arith.constant 0 : index
    %c0_57 = arith.constant 0 : index
    %c66 = arith.constant 66 : index
    %58 = vector.load %arg2[%c0_55, %c0_56, %c0_57, %c66] : memref<1x1x4x384xbf16, #tpu.memory_space<vmem>>, vector<1x1x4x256xbf16>
    %59 = vector.shape_cast %58 : vector<1x1x4x256xbf16> to vector<4x256xbf16>
    %c7 = arith.constant 7 : index
    %c0_58 = arith.constant 0 : index
    %c0_59 = arith.constant 0 : index
    %60 = vector.load %arg3[%c7, %c0_58, %c0_59] : memref<9x8x4xbf16, #tpu.memory_space<vmem>>, vector<1x8x4xbf16>
    %61 = vector.shape_cast %60 : vector<1x8x4xbf16> to vector<8x4xbf16>
    %cst_60 = arith.constant dense<0.000000e+00> : vector<8x256xf32>
    %62 = tpu.matmul %61, %59, %cst_60 {dimension_numbers = #tpu.dot_dimension_numbers<[1], [0], [0], [1], [0, 0, 1, 1], [], []>} : vector<8x4xbf16>, vector<4x256xbf16>, vector<8x256xf32> -> vector<8x256xf32>
    %63 = arith.addf %57, %62 : vector<8x256xf32>
    %c0_61 = arith.constant 0 : index
    %c0_62 = arith.constant 0 : index
    %c0_63 = arith.constant 0 : index
    %c68 = arith.constant 68 : index
    %64 = vector.load %arg2[%c0_61, %c0_62, %c0_63, %c68] : memref<1x1x4x384xbf16, #tpu.memory_space<vmem>>, vector<1x1x4x256xbf16>
    %65 = vector.shape_cast %64 : vector<1x1x4x256xbf16> to vector<4x256xbf16>
    %c2_64 = arith.constant 2 : index
    %c0_65 = arith.constant 0 : index
    %66 = vector.load %arg4[%c2_64, %c0_65] : memref<3x256xbf16, #tpu.memory_space<vmem>>, vector<1x256xbf16>
    %67 = vector.broadcast %66 : vector<1x256xbf16> to vector<4x256xbf16>
    %68 = arith.mulf %65, %67 : vector<4x256xbf16>
    %c8 = arith.constant 8 : index
    %c0_66 = arith.constant 0 : index
    %c0_67 = arith.constant 0 : index
    %69 = vector.load %arg3[%c8, %c0_66, %c0_67] : memref<9x8x4xbf16, #tpu.memory_space<vmem>>, vector<1x8x4xbf16>
    %70 = vector.shape_cast %69 : vector<1x8x4xbf16> to vector<8x4xbf16>
    %cst_68 = arith.constant dense<0.000000e+00> : vector<8x256xf32>
    %71 = tpu.matmul %70, %68, %cst_68 {dimension_numbers = #tpu.dot_dimension_numbers<[1], [0], [0], [1], [0, 0, 1, 1], [], []>} : vector<8x4xbf16>, vector<4x256xbf16>, vector<8x256xf32> -> vector<8x256xf32>
    %72 = arith.addf %63, %71 : vector<8x256xf32>
    %c0_69 = arith.constant 0 : index
    %c0_70 = arith.constant 0 : index
    %73 = vector.load %arg5[%c0_69, %c0_70] : memref<8x1xf32, #tpu.memory_space<vmem>>, vector<8x1xf32>
    %74 = vector.broadcast %73 : vector<8x1xf32> to vector<8x256xf32>
    %75 = arith.mulf %72, %74 : vector<8x256xf32>
    %c0_71 = arith.constant 0 : index
    %c0_72 = arith.constant 0 : index
    %76 = vector.load %arg6[%c0_71, %c0_72] : memref<8x1xf32, #tpu.memory_space<vmem>>, vector<8x1xf32>
    %77 = vector.broadcast %76 : vector<8x1xf32> to vector<8x256xf32>
    %78 = arith.addf %75, %77 : vector<8x256xf32>
    %cst_73 = arith.constant 0.000000e+00 : f32
    %79 = vector.broadcast %cst_73 : f32 to vector<8x256xf32>
    %80 = arith.maximumf %78, %79 : vector<8x256xf32>
    %c0_74 = arith.constant 0 : index
    %c0_75 = arith.constant 0 : index
    %c0_76 = arith.constant 0 : index
    %81 = vector.load %arg7[%c0_74, %c0_75, %c0_76] : memref<1x8x256xf32, #tpu.memory_space<vmem>>, vector<1x8x256xf32>
    %82 = vector.shape_cast %81 : vector<1x8x256xf32> to vector<8x256xf32>
    %83 = vector.shape_cast %80 : vector<8x256xf32> to vector<1x8x256xf32>
    tpu.vector_store %arg7[%c0_74, %c0_75, %c0_76], %83 {strides = array<i32>} : memref<1x8x256xf32, #tpu.memory_space<vmem>>, vector<1x8x256xf32>,
    return
  }
  func.func @transform_0(%arg0: i32, %arg1: i32) -> (i32, i32, i32, i32) {
    %c0_i32 = arith.constant 0 : i32
    %c0_i32_0 = arith.constant 0 : i32
    %c0_i32_1 = arith.constant 0 : i32
    return %arg0, %arg1, %c0_i32, %c0_i32_0 : i32, i32, i32, i32
  }
  func.func @transform_1(%arg0: i32, %arg1: i32) -> (i32, i32, i32) {
    %c0_i32 = arith.constant 0 : i32
    %c0_i32_0 = arith.constant 0 : i32
    %c0_i32_1 = arith.constant 0 : i32
    %c0_i32_2 = arith.constant 0 : i32
    return %c0_i32, %c0_i32_0, %c0_i32_1 : i32, i32, i32
  }
  func.func @transform_2(%arg0: i32, %arg1: i32) -> (i32, i32) {
    %c0_i32 = arith.constant 0 : i32
    %c0_i32_0 = arith.constant 0 : i32
    %c0_i32_1 = arith.constant 0 : i32
    return %c0_i32, %c0_i32_0 : i32, i32
  }
  func.func @transform_3(%arg0: i32, %arg1: i32) -> (i32, i32) {
    %c0_i32 = arith.constant 0 : i32
    %c0_i32_0 = arith.constant 0 : i32
    %c0_i32_1 = arith.constant 0 : i32
    return %c0_i32, %c0_i32_0 : i32, i32
  }
  func.func @transform_4(%arg0: i32, %arg1: i32) -> (i32, i32) {
    %c0_i32 = arith.constant 0 : i32
    %c0_i32_0 = arith.constant 0 : i32
    %c0_i32_1 = arith.constant 0 : i32
    return %c0_i32, %c0_i32_0 : i32, i32
  }
  func.func @transform_5(%arg0: i32, %arg1: i32) -> (i32, i32, i32) {
    %c0_i32 = arith.constant 0 : i32
    %c0_i32_0 = arith.constant 0 : i32
    return %arg0, %c0_i32, %arg1 : i32, i32, i32
  }
}

</mosaic_0001>

<bundles_post_ra>
// kernel: aspp_conv_forward.1
= control target key start
LH: loop header
LB: loop body
LE: loop exit
PB: predicated region body
PF: predicated region fallthrough
CT: control target
= control target key end

     0   :  { %s1367_s18 = smov 0   ;;  %s1369_s19 = smov 0   ;;  %s1537_s0 = inlined_call_operand.vmem [shape: bf16[2,1,4,384], index: 0, kind: input, shape index: {}]   ;;  %s1538_s1 = inlined_call_operand.vmem [shape: bf16[9,8,4], index: 1, kind: input, shape index: {}]   ;;  %s1539_s2 = inlined_call_operand.vmem [shape: bf16[3,256], index: 2, kind: input, shape index: {}]   ;;  %s1540_s3 = inlined_call_operand.vmem [shape: f32[8,1], index: 3, kind: input, shape index: {}]   ;;  %s1541_s4 = inlined_call_operand.vmem [shape: f32[8,1], index: 4, kind: input, shape index: {}]   ;;  %s1542_s5 = inlined_call_operand.vmem [shape: f32[2,8,256], index: 5, kind: output, shape index: {}]  }
   0x1   :  { %s1371_s20 = smov 0  }
   0x2 LB: > { %s27_s21 = sadd.s32 1, %s1317_s19  ;;  %p1190_p0 = scmp.ge.s32.totalorder %s1321_s20, 1  ;;  %s1321_s20 = sphi %s1371_s20, %s15_s20   ;;  %s1317_s19 = sphi %s1369_s19, %s1544_s19   ;;  %s1313_s18 = sphi %s1367_s18, %s1543_s18  }
   0x3   : > { %p29_p1 = scmp.ge.s32.totalorder %s27_s21, 2  ;;  %p207_p2 = scmp.lt.s32.totalorder %s1321_s20, 3 }
   0x5   : > { %s1546_s21 = smov (%p29_p1, %s27_s21), 0  ;;  %p208_p3 = pnand %p1190_p0, %p207_p2 }
   0x6   : > { %v277_v0 = vlaneseq (!%p208_p3)  ;;  %v1200_v1 = vld.sshfl [vmem:[%s1539_s2] sm:$0x22 pattern:$0x76325410] (!%p208_p3)  ;;  %v1323_v2 = vmov (!%p208_p3), 1983009808  }
   0x7   : > { %211 = sbr.rel (%p208_p3) target bundleno = 522 (0x20a), region = 40  ;;  %v292_v3 = vunpack.c.l.s4 (!%p208_p3), %v1323_v2  ;;  %v451_v4 = vcombine.high (!%p208_p3), %v1200_v1, %v1200_v1  ;;  %v1194_v5 = vld.sshfl [vmem:[%s1539_s2] sm:$0x11 pattern:$0x76325410] (!%p208_p3)  ;;  %v453_v7 = vpack.i.b16 (!%p208_p3), %v1200_v1, %v1200_v1  ;;  %p243_p4 = scmp.lt.s32.totalorder (!%p208_p3), %s1313_s18, 1 }
   0x8   : > { %v278_v6 = vshrl.u32 (!%p208_p3), %v277_v0, 7  ;;  %v273_v8 = vcombine.high (!%p208_p3), %v1194_v5, %v1194_v5  ;;  %v275_v9 = vpack.i.b16 (!%p208_p3), %v1194_v5, %v1194_v5  ;;  %s1324_s30 = smov (!%p208_p3), 36   ;;  %s1325_s6 = smov (!%p208_p3), 4   ;;  %v1331_v36 = vmov (!%p208_p3), 0  }
   0x9   : > { %v293_v10 = vunpack.c.0.s8 (!%p208_p3), %v292_v3  ;;  %v460_v11 = vpack.i.b16 (!%p208_p3), %v451_v4, %v451_v4  ;;  %s1326_s7 = smov (!%p208_p3), 64   ;;  %s1327_s8 = smov (!%p208_p3), 32   ;;  %721 = vmatprep.mubr.bf16.mxu0 (!%p208_p3), %v1331_v36  ;;  %373 = vmatprep.mubr.bf16.mxu1 (!%p208_p3), %v1331_v36  ;;  %vm736_vm0 = vcmask (!%p208_p3), 293888   ;;  %vm824_vm1 = vcmask (!%p208_p3), 523264  }
   0xa   : > { %v457_v12 = vsub.s32 (!%p208_p3), 1, %v278_v6  ;;  %v279_v13 = vsub.s32 (!%p208_p3), 0, %v278_v6  ;;  %v282_v14 = vpack.i.b16 (!%p208_p3), %v273_v8, %v273_v8  ;;  %s1328_s9 = smov (!%p208_p3), 68   ;;  %s1329_s10 = smov (!%p208_p3), 94   ;;  %1294 = vset.pattern.permute.xlu1 (!%p208_p3), %v1331_v36  ;;  %1295 = vset.pattern.permute.xlu0 (!%p208_p3), %v1331_v36  ;;  %vm330_vm2 = vcmask (!%p208_p3), 31744  }
   0xb   : > { %v1393_v15 = vsub.s32 (!%p208_p3), %v293_v10, %v278_v6  ;;  %s1330_s11 = smov (!%p208_p3), 126   ;;  %s1332_s12 = smov (!%p208_p3), 92   ;;  %vm677_vm3 = vcmask (!%p208_p3), 769024   ;;  %vm334_vm4 = vcmask (!%p208_p3), 1041408   ;;  %vm327_vm5 = vcmask (!%p208_p3), 1031168  }
   0xc   : > { %v458_v16 = vrot.slane (!%p208_p3), %v453_v7, %v457_v12  ;;  %v465_v17 = vrot.slane (!%p208_p3), %v460_v11, %v457_v12  ;;  %v280_v18 = vrot.slane (!%p208_p3), %v275_v9, %v279_v13  ;;  %v287_v19 = vrot.slane (!%p208_p3), %v282_v14, %v279_v13  ;;  %v1207_v6 = vld [vmem:[%s1538_s1 + $0x10] sm:$0xf] (!%p208_p3)  ;;  %s1333_s15 = smov (!%p208_p3), 124   ;;  %s1334_s16 = smov (!%p208_p3), 62  }
   0xd   : > { %vm567_vm6 = vcmask (!%p208_p3), 261120   ;;  %vm992_vm7 = vcmask (!%p208_p3), 556032   ;;  %s1335_s23 = smov (!%p208_p3), 96   ;;  %s1336_s24 = smov (!%p208_p3), 60   ;;  %vm765_vm8 = vcmask (!%p208_p3), 752640   ;;  %vm933_vm9 = vcmask (!%p208_p3), 506880  }
   0xe   : > { %s1548_s18 = smov (!%p243_p4, %s1313_s18), 1  ;;  %v468_v20 = vcombine.low %v458_v16, %v465_v17  ;;  %v290_v21 = vcombine.low %v280_v18, %v287_v19  ;;  %vm508_vm10 = vcmask 1014784   ;;  %vm596_vm11 = vcmask 785408  }
   0xf   : > { %s1255_s26 = smul.u32 6, %s1548_s18  ;;  %vm1021_vm12 = vcmask 490496   ;;  %s1224_s22 = sshll.u32 %s1548_s18, 4 }
  0x10   : > { %v475_v23 = vrot.slane %v468_v20, %v1393_v15  ;;  %v1406_v24 = vrot.slane %v290_v21, %v1393_v15  ;;  %s260_s25 = scalar_lea.vmem %s1542_s5, %s1224_s22 }
  0x11   : > { %s1399_s29 = scalar_lea.vmem %s1537_s0, %s1255_s26 }
  0x12   : > { %v1402_v22 = vld [vmem:[%s1399_s29] sm:$0xf]  ;;  %733 = vrot.lane.b32.xlu0 %v475_v23, %s1324_s30  ;;  %476 = vrot.lane.b32.xlu1 %v475_v23, %s1325_s6 }
  0x13   : > { %v299_v25 = vmul.bf16 %v1406_v24, %v1402_v22  ;;  %v651_v26 = vld [vmem:[%s1399_s29] sm:$0x3f] }
  0x14   : > { %v662_v27 = vrot.slane %v651_v26, %v1393_v15  ;;  %v655_v28 = vcombine.high %v651_v26, %v651_v26  ;;  %v301_v29 = vld [vmem:[%s1399_s29] sm:$0x3f] }
  0x15   : > { %v312_v32 = vrot.slane %v301_v29, %v1393_v15  ;;  %v305_v34 = vcombine.high %v301_v29, %v301_v29  ;;  %v732_v39 = vld [vmem:[%s1399_s29] sm:$0x3f]  ;;  %v389_v10 = vrot.slane %v299_v25, %v1393_v15 }
  0x16   : > { %821 = vrot.lane.b32.xlu0 %v1406_v24, %s1326_s7  ;;  %564 = vrot.lane.b32.xlu1 %v1406_v24, %s1327_s8  ;;  %v670_v30 = vcombine.high %v662_v27, %v662_v27  ;;  %v669_v31 = vrot.slane %v655_v28, %v1393_v15  ;;  %v820_v45 = vld [vmem:[%s1399_s29] sm:$0x3f] }
  0x17   : > { %v320_v33 = vcombine.high %v312_v32, %v312_v32  ;;  %v319_v35 = vrot.slane %v305_v34, %v1393_v15  ;;  %v441_v55 = vld [vmem:[%s1399_s29] sm:$0x3f]  ;;  %v390_v20 = vcombine.high %v389_v10, %v389_v10 }
  0x18   : > { %v907_v62 = vld [vmem:[%s1399_s29] sm:$0x3f] }
  0x19   : > { %v918_v5 = vrot.slane %v907_v62, %v1393_v15  ;;  %v911_v13 = vcombine.high %v907_v62, %v907_v62  ;;  %v563_v21 = vld [vmem:[%s1399_s29] sm:$0x3f] }
  0x1a   : > { %989 = vrot.lane.b32.xlu0 %v475_v23, %s1328_s9  ;;  %671 = vrot.lane.b32.xlu1 %v662_v27, %s1329_s10  ;;  %v988_v25 = vld [vmem:[%s1399_s29] sm:$0x3f] }
  0x1b   : > { %v926_v14 = vcombine.high %v918_v5, %v918_v5  ;;  %v925_v24 = vrot.slane %v911_v13, %v1393_v15  ;;  %v1195_v27 = vld [vmem:[%s1538_s1 + $0x4] sm:$0xf]  ;;  %v1216_v13 = vld [vmem:[%s1538_s1 + $0x1c] sm:$0xf] }
  0x1e   : > { %673 = vrot.lane.b32.xlu0 %v670_v30, %s1329_s10  ;;  %675 = vrot.lane.b32.xlu1 %v669_v31, %s1329_s10  ;;  %v395_v30 = vsel %vm334_vm4, %v389_v10, 0 }
  0x22   : > { %321 = vrot.lane.b32.xlu0 %v312_v32, %s1330_s11  ;;  %323 = vrot.lane.b32.xlu1 %v320_v33, %s1330_s11 }
  0x26   : > { %325 = vrot.lane.b32.xlu0 %v319_v35, %s1330_s11 }
  0x84   : > { %v734_v37 = vpop.permute.xlu0 %733  ;;  %v477_v38 = vpop.permute.xlu1 %476 }
  0x85   : > { %v735_v40 = vrot.slane %v734_v37, 6  ;;  %v478_v47 = vrot.slane %v477_v38, 6 }
  0x87   : > { %v737_v41 = vsel %vm736_vm0, %v735_v40, %v734_v37  ;;  %v480_v56 = vsel %vm330_vm2, %v478_v47, %v477_v38 }
  0x88   : > { %v739_v42 = vmul.bf16 %v737_v41, %v732_v39  ;;  %v822_v43 = vpop.permute.xlu0 %821  ;;  %v565_v44 = vpop.permute.xlu1 %564  ;;  %v482_v60 = vmul.bf16 %v480_v56, %v441_v55  ;;  %v300_v39 = vld [vmem:[%s1538_s1] sm:$0xf] }
  0x89   : > { %v823_v46 = vrot.slane %v822_v43, 6  ;;  %v566_v11 = vrot.slane %v565_v44, 6 }
  0x8a   : > { %v743_v48 = vcombine.high %v739_v42, %v739_v42  ;;  %v750_v49 = vrot.slane %v739_v42, %v1393_v15  ;;  %v493_v7 = vrot.slane %v482_v60, %v1393_v15  ;;  %v486_v17 = vcombine.high %v482_v60, %v482_v60 }
  0x8b   : > { %v825_v50 = vsel %vm824_vm1, %v823_v46, %v822_v43  ;;  %v568_v22 = vsel %vm567_vm6, %v566_v11, %v565_v44  ;;  %v1076_v43 = vld [vmem:[%s1540_s3] sm:$0xff] }
  0x8c   : > { %v827_v51 = vmul.bf16 %v825_v50, %v820_v45  ;;  %759 = vrot.lane.b32.xlu1 %v750_v49, %s1332_s12  ;;  %v758_v52 = vcombine.high %v750_v49, %v750_v49  ;;  %v990_v53 = vpop.permute.xlu0 %989  ;;  %v672_v54 = vpop.permute.xlu1 %671  ;;  %v757_v58 = vrot.slane %v743_v48, %v1393_v15  ;;  %v570_v28 = vmul.bf16 %v568_v22, %v563_v21  ;;  %v1084_v44 = vld [vmem:[%s1541_s4] sm:$0xff]  ;;  %v1204_v21 = vld [vmem:[%s1538_s1 + $0xc] sm:$0xf] }
  0x8d   : > { %v991_v16 = vrot.slane %v990_v53, 6  ;;  %v500_v29 = vrot.slane %v486_v17, %v1393_v15  ;;  %v501_v33 = vcombine.high %v493_v7, %v493_v7  ;;  %v1219_v22 = vld [vmem:[%s1538_s1 + $0x20] sm:$0xf] }
  0x8e   : > { %v831_v57 = vcombine.high %v827_v51, %v827_v51  ;;  %761 = vrot.lane.b32.xlu0 %v758_v52, %s1332_s12  ;;  %v838_v59 = vrot.slane %v827_v51, %v1393_v15  ;;  %v574_v32 = vcombine.high %v570_v28, %v570_v28  ;;  %v581_v34 = vrot.slane %v570_v28, %v1393_v15  ;;  %v1210_v51 = vld [vmem:[%s1538_s1 + $0x14] sm:$0xf] }
  0x8f   : > { %v993_v26 = vsel %vm992_vm7, %v991_v16, %v990_v53 }
  0x90   : > { %763 = vrot.lane.b32.xlu1 %v757_v58, %s1332_s12  ;;  %v846_v61 = vcombine.high %v838_v59, %v838_v59  ;;  %v674_v63 = vpop.permute.xlu0 %673  ;;  %v676_v0 = vpop.permute.xlu1 %675  ;;  %v845_v3 = vrot.slane %v831_v57, %v1393_v15  ;;  %v995_v31 = vmul.bf16 %v993_v26, %v988_v25  ;;  %v588_v37 = vrot.slane %v574_v32, %v1393_v15 }
  0x91   : > { %v679_v1 = vsel %vm677_vm3, %v674_v63, %v676_v0  ;;  %v678_v2 = vsel %vm677_vm3, %v672_v54, %v674_v63  ;;  %v589_v38 = vcombine.high %v581_v34, %v581_v34  ;;  %v1213_v63 = vld [vmem:[%s1538_s1 + $0x18] sm:$0xf] }
  0x92   : > { %847 = vrot.lane.b32.xlu0 %v838_v59, %s1326_s7  ;;  %1208 = vmatprep.subr.msk.bf16.mxu0 %vm334_vm4, %v679_v1  ;;  %v684_v4 = vsel %vm334_vm4, %v678_v2, 0  ;;  %v1006_v35 = vrot.slane %v995_v31, %v1393_v15  ;;  %v999_v40 = vcombine.high %v995_v31, %v995_v31 }
  0x93   : > { %690 = vmatpush1.bf16.msra.mxu0 %v684_v4 }
  0x94   : > { %849 = vrot.lane.b32.xlu1 %v846_v61, %s1326_s7  ;;  %v322_v8 = vpop.permute.xlu0 %321  ;;  %v324_v9 = vpop.permute.xlu1 %323  ;;  %v1014_v41 = vcombine.high %v1006_v35, %v1006_v35  ;;  %v1013_v42 = vrot.slane %v999_v40, %v1393_v15 }
  0x95   : > { %v328_v12 = vsel %vm327_vm5, %v322_v8, %v324_v9 }
  0x96   : > { %851 = vrot.lane.b32.xlu0 %v845_v3, %s1326_s7  ;;  %1209 = vmatmul.mubr.msk.bf16.vlgmr.msra.gmra.mrb[0].mxu0 %vm330_vm2, %v1207_v6  ;;  %v336_v19 = vsel %vm334_vm4, %v328_v12, 0 }
  0x97   : > { %809 = vmatprep.mubr.bf16.mxu0 %v1331_v36 }
  0x98   : > { %502 = vrot.lane.b32.xlu1 %v493_v7, %s1333_s15  ;;  %v326_v18 = vpop.permute.xlu0 %325  ;;  %v1201_v7 = vld [vmem:[%s1538_s1 + $0x8] sm:$0xf] }
  0x99   : > { %v329_v23 = vsel %vm327_vm5, %v324_v9, %v326_v18 }
  0x9a   : > { %927 = vrot.lane.b32.xlu0 %v918_v5, %s1334_s16  ;;  %1196 = vmatprep.subr.msk.bf16.mxu1 %vm334_vm4, %v329_v23 }
  0x9b   : > { %342 = vmatpush1.bf16.msra.mxu1 %v336_v19 }
  0x9c   : > { %929 = vrot.lane.b32.xlu1 %v926_v14, %s1334_s16  ;;  %1198 = vmatprep.subr.msk.bf16.mxu1 %vm334_vm4, %v390_v20 }
  0x9e   : > { %931 = vrot.lane.b32.xlu0 %v925_v24, %s1334_s16  ;;  %1197 = vmatmul.mubr.msk.bf16.vlgmr.msra.gmra.mrb[0].mxu1 %vm330_vm2, %v1195_v27 }
  0x9f   : > { %401 = vmatpush1.bf16.msra.mxu1 %v395_v30  ;;  %432 = vmatprep.mubr.bf16.mxu1 %v1331_v36 }
  0xa0   : > { %506 = vrot.lane.b32.xlu1 %v500_v29, %s1333_s15 }
  0xa2   : > { %504 = vrot.lane.b32.xlu0 %v501_v33, %s1333_s15 }
  0xa4   : > { %590 = vrot.lane.b32.xlu1 %v581_v34, %s1335_s23 }
  0xa6   : > { %1015 = vrot.lane.b32.xlu0 %v1006_v35, %s1336_s24 }
  0xa8   : > { %594 = vrot.lane.b32.xlu1 %v588_v37, %s1335_s23 }
  0xaa   : > { %592 = vrot.lane.b32.xlu0 %v589_v38, %s1335_s23  ;;  %1199 = vmatmul.mubr.msk.bf16.vlgmr.msra.gmra.mrb[0].mxu1 %vm330_vm2, %v300_v39 }
  0xab   : > { %552 = vmatprep.mubr.bf16.mxu1 %v1331_v36 }
  0xac   : > { %1017 = vrot.lane.b32.xlu1 %v1014_v41, %s1336_s24 }
  0xae   : > { %1019 = vrot.lane.b32.xlu0 %v1013_v42, %s1336_s24 }
  0xb0   : > { %1079 = vperm.xlu1 %1294, %v1076_v43  }
  0xb2   : > { %1087 = vperm.xlu0 %1295, %v1084_v44  }
  0xfe   : > { %v760_v45 = vpop.permute.xlu1 %759 }
 0x100   : > { %v762_v46 = vpop.permute.xlu0 %761 }
 0x101   : > { %v766_v47 = vsel %vm765_vm8, %v760_v45, %v762_v46 }
 0x102   : > { %v764_v48 = vpop.permute.xlu1 %763  ;;  %v772_v50 = vsel %vm334_vm4, %v766_v47, 0 }
 0x103   : > { %v767_v49 = vsel %vm765_vm8, %v762_v46, %v764_v48 }
 0x104   : > { %1211 = vmatprep.subr.msk.bf16.mxu0 %vm334_vm4, %v767_v49  ;;  %v848_v15 = vpop.permute.xlu0 %847 }
 0x105   : > { %778 = vmatpush1.bf16.msra.mxu0 %v772_v50 }
 0x106   : > { %v850_v52 = vpop.permute.xlu1 %849 }
 0x107   : > { %v853_v53 = vsel %vm824_vm1, %v848_v15, %v850_v52 }
 0x108   : > { %v859_v54 = vsel %vm334_vm4, %v853_v53, 0  ;;  %1212 = vmatmul.mubr.msk.bf16.vlgmr.msra.gmra.mrb[0].mxu0 %vm330_vm2, %v1210_v51  ;;  %v852_v55 = vpop.permute.xlu0 %851 }
 0x109   : > { %v854_v56 = vsel %vm824_vm1, %v850_v52, %v852_v55  ;;  %896 = vmatprep.mubr.bf16.mxu0 %v1331_v36 }
 0x10a   : > { %v503_v57 = vpop.permute.xlu1 %502  ;;  %1214 = vmatprep.subr.msk.bf16.mxu0 %vm334_vm4, %v854_v56 }
 0x10b   : > { %865 = vmatpush1.bf16.msra.mxu0 %v859_v54 }
 0x10c   : > { %v928_v58 = vpop.permute.xlu0 %927 }
 0x10e   : > { %v930_v59 = vpop.permute.xlu1 %929 }
 0x10f   : > { %v934_v60 = vsel %vm933_vm9, %v928_v58, %v930_v59 }
 0x110   : > { %v932_v61 = vpop.permute.xlu0 %931  ;;  %v940_v0 = vsel %vm334_vm4, %v934_v60, 0 }
 0x111   : > { %v935_v62 = vsel %vm933_vm9, %v930_v59, %v932_v61 }
 0x112   : > { %v507_v1 = vpop.permute.xlu1 %506  ;;  %1217 = vmatprep.subr.msk.bf16.mxu0 %vm334_vm4, %v935_v62 }
 0x114   : > { %1215 = vmatmul.mubr.msk.bf16.vlgmr.msra.gmra.mrb[0].mxu0 %vm330_vm2, %v1213_v63  ;;  %v505_v2 = vpop.permute.xlu0 %504 }
 0x115   : > { %v509_v3 = vsel %vm508_vm10, %v503_v57, %v505_v2  ;;  %v510_v4 = vsel %vm508_vm10, %v505_v2, %v507_v1  ;;  %946 = vmatpush1.bf16.msra.mxu0 %v940_v0  ;;  %977 = vmatprep.mubr.bf16.mxu0 %v1331_v36 }
 0x116   : > { %v515_v5 = vsel %vm334_vm4, %v509_v3, 0  ;;  %v591_v6 = vpop.permute.xlu1 %590  ;;  %1202 = vmatprep.subr.msk.bf16.mxu1 %vm334_vm4, %v510_v4 }
 0x117   : > { %521 = vmatpush1.bf16.msra.mxu1 %v515_v5 }
 0x118   : > { %v1016_v8 = vpop.permute.xlu0 %1015 }
 0x11a   : > { %v595_v9 = vpop.permute.xlu1 %594  ;;  %1203 = vmatmul.mubr.msk.bf16.vlgmr.msra.gmra.mrb[0].mxu1 %vm330_vm2, %v1201_v7 }
 0x11b   : > { %640 = vmatprep.mubr.bf16.mxu1 %v1331_v36 }
 0x11c   : > { %v593_v10 = vpop.permute.xlu0 %592 }
 0x11d   : > { %v597_v11 = vsel %vm596_vm11, %v591_v6, %v593_v10  ;;  %v598_v12 = vsel %vm596_vm11, %v593_v10, %v595_v9 }
 0x11e   : > { %v603_v14 = vsel %vm334_vm4, %v597_v11, 0  ;;  %v1018_v16 = vpop.permute.xlu1 %1017  ;;  %1205 = vmatprep.subr.msk.bf16.mxu1 %vm334_vm4, %v598_v12 }
 0x11f   : > { %v1022_v17 = vsel %vm1021_vm12, %v1016_v8, %v1018_v16  ;;  %609 = vmatpush1.bf16.msra.mxu1 %v603_v14 }
 0x120   : > { %1218 = vmatmul.mubr.msk.bf16.vlgmr.msra.gmra.mrb[0].mxu0 %vm330_vm2, %v1216_v13  ;;  %v1020_v18 = vpop.permute.xlu0 %1019  ;;  %v1028_v20 = vsel %vm334_vm4, %v1022_v17, 0 }
 0x121   : > { %v1023_v19 = vsel %vm1021_vm12, %v1018_v16, %v1020_v18  ;;  %1065 = vmatprep.mubr.bf16.mxu0 %v1331_v36 }
 0x122   : > { %1220 = vmatprep.subr.msk.bf16.mxu0 %vm334_vm4, %v1023_v19 }
 0x123   : > { %1034 = vmatpush1.bf16.msra.mxu0 %v1028_v20 }
 0x126   : > { %1206 = vmatmul.mubr.msk.bf16.vlgmr.msra.gmra.mrb[0].mxu1 %vm330_vm2, %v1204_v21 }
 0x12c   : > { %1221 = vmatmul.mubr.msk.bf16.vlgmr.msra.gmra.mrb[0].mxu0 %vm330_vm2, %v1219_v22 }
 0x12f   : > { %v1080_v27 = vpop.permute.xlu1 %1079 }
 0x131   : > { %v1088_v32 = vpop.permute.xlu0 %1087 }
 0x1f9   : > { %v642_v23 = vpop.f32.mrb[0].mxu1 }
 0x1fa   : > { %v644_v36 = vpop.f32.mrb[1].mxu1 }
 0x1fb   : > { %v646_v24 = vpop.f32.mrb[2].mxu1 }
 0x1fc   : > { %v647_v25 = vpop.f32.mrb[3].mxu1 }
 0x1ff   : > { %v1067_v26 = vpop.f32.mrb[0].mxu0 }
 0x200   : > { %v1225_v28 = vadd.f32 %v1067_v26, %v642_v23  ;;  %v1069_v29 = vpop.f32.mrb[1].mxu0 }
 0x201   : > { %v1226_v30 = vadd.f32 %v1069_v29, %v644_v36  ;;  %v1071_v31 = vpop.f32.mrb[2].mxu0 }
 0x202   : > { %v1082_v33 = vmul.f32 %v1225_v28, %v1080_v27  ;;  %v1072_v34 = vpop.f32.mrb[3].mxu0 }
 0x203   : > { %v1083_v35 = vmul.f32 %v1226_v30, %v1080_v27 }
 0x204   : > { %v1090_v37 = vadd.f32 %v1088_v32, %v1082_v33 }
 0x205   : > { %v1091_v38 = vadd.f32 %v1088_v32, %v1083_v35 }
 0x206   : > { %v1092_v39 = vmax.f32 %v1090_v37, 0.0 }
 0x207   : > { %v1093_v40 = vmax.f32 %v1091_v38, 0.0 }
 0x208   : > { %1094 = vst [vmem:[%s260_s25] sm:$0xff] %v1092_v39 }
 0x209   : > { %1095 = vst [vmem:[%s260_s25 + $0x8] sm:$0xff] %v1093_v40 }
 0x20a PF: > { %s15_s20 = sadd.s32 1, %s1321_s20   ;;  %s1543_s18 = smov %s1317_s19 }
 0x20b   : > { %p12_p5 = scmp.ge.s32.totalorder %s15_s20, 4   ;;  %s1544_s19 = smov %s1546_s21 }
 0x20d   :  { %14 = sbr.rel (!%p12_p5) target bundleno = 2 (0x2), region = 78 }

</bundles_post_ra>
